<compile_context>
chip_gen: v7x
topology: tpu7x:2x2x1
jax: 0.10.0
libtpu: 0.0.40
codegen_flags: <defaults>
</compile_context>

<pallas_src>
import jax
import jax.numpy as jnp
from jax import lax
from jax.experimental import pallas as pl
from jax.experimental.pallas import tpu as pltpu

LANE = 128
_VMEM_LIMIT = 32 * 1024 * 1024  # safe on v5e / v6e / v7x; working set is tiny


def _round_up(x, m):
    return (x + m - 1) // m * m


# Measured mem-bound efficiency vs. F-tile width (from the TPU kernel docs);
# used only as a heuristic to trade padded zero-traffic against DMA efficiency.
_TILE_EFF = ((128, 0.29), (256, 0.63), (512, 0.85),
             (1024, 0.86), (2048, 0.87), (4096, 0.87))


def _choose_tiling(f):
    """Pick (TF, Fp): TF = F-tile width (multiple of 128), Fp = padded F."""
    f128 = _round_up(max(f, LANE), LANE)
    best_tf, best_cost = LANE, None
    for tf, eff in _TILE_EFF:
        if tf > f128:
            break
        fp = _round_up(f128, tf)
        cost = fp / eff  # padded bytes / achieved-bandwidth fraction
        if best_cost is None or cost < best_cost:
            best_tf, best_cost = tf, cost
    return best_tf, _round_up(f128, best_tf)


# ---------------------------------------------------------------------------
# Single fused kernel: interpolation + first-layer forward + Gram matrix,
# with F as the (inner, "arbitrary") reduction axis and an optional leading
# "parallel" axis that splits the reduction across TensorCores (v7x).
#   pre_c += (eps*real + (1-eps)*fake)_tile @ W1_tile          (B, H)
#   G_c   += W1_tile^T @ W1_tile                               (H, H)
# Neither `interp` (B, F) nor any (B, F) gradient is ever materialized.
# ---------------------------------------------------------------------------
def _gp_fwd_gram_kernel(eps_ref, real_ref, fake_ref, w1_ref, pre_ref, gram_ref):
    k = pl.program_id(1)

    @pl.when(k == 0)
    def _():
        pre_ref[...] = jnp.zeros_like(pre_ref)
        gram_ref[...] = jnp.zeros_like(gram_ref)

    eps = eps_ref[...]                                        # (B, 1) resident
    x = eps * real_ref[...] + (1.0 - eps) * fake_ref[...]     # (B, TF) interp tile
    w1 = w1_ref[...]                                          # (TF, H) raw W1 tile

    # Forward pre-activation contribution.
    pre_ref[...] += jnp.dot(x, w1, preferred_element_type=jnp.float32)   # (B, H)

    # Gram contribution: contract the shared F axis (dim 0 of both operands);
    # dot_general lets the MXU consume the transposed operand natively.
    gram_ref[...] += lax.dot_general(
        w1, w1,
        dimension_numbers=(((0,), (0,)), ((), ())),
        preferred_element_type=jnp.float32)                               # (H, H)


# ---------------------------------------------------------------------------
# Gradient_Penalty.forward equivalent for a fixed 2-layer MLP discriminator.
# ---------------------------------------------------------------------------
def gradient_penalty(params, real, fake, key):
    W1, b1, W2, b2 = params
    del b2  # additive constant in D(interp); its input-gradient is zero

    B = real.shape[0]
    real_flat = real.reshape(B, -1).astype(jnp.float32)
    fake_flat = fake.reshape(B, -1).astype(jnp.float32)
    F = real_flat.shape[1]
    H = W1.shape[1]

    # torch: eps = Tensor(np.random.random((B, 1, 1, 1)))
    eps = jax.random.uniform(key, (B, 1), dtype=jnp.float32)

    TF, Fp = _choose_tiling(F)
    n_tiles = Fp // TF
    # v7x megacore: split the F reduction across 2 TCs with per-core partials.
    # On 1-TC chips the size-2 "parallel" axis is just a 2-iteration loop.
    ncore = 2 if (n_tiles >= 2 and n_tiles % 2 == 0) else 1
    tpc = n_tiles // ncore  # tiles per core

    W1f = W1.astype(jnp.float32)
    if Fp != F:
        pad = Fp - F  # zero rows/cols are numerically inert for pre and G
        real_flat = jnp.pad(real_flat, ((0, 0), (0, pad)))
        fake_flat = jnp.pad(fake_flat, ((0, 0), (0, pad)))
        W1f = jnp.pad(W1f, ((0, pad), (0, 0)))

    pre_part, gram_part = pl.pallas_call(
        _gp_fwd_gram_kernel,
        out_shape=(
            jax.ShapeDtypeStruct((ncore, B, H), jnp.float32),
            jax.ShapeDtypeStruct((ncore, H, H), jnp.float32),
        ),
        grid_spec=pltpu.PrefetchScalarGridSpec(
            num_scalar_prefetch=0,
            grid=(ncore, tpc),
            in_specs=[
                pl.BlockSpec((B, 1), lambda c, k: (0, 0)),                  # eps (resident)
                pl.BlockSpec((B, TF), lambda c, k, t=tpc: (0, c * t + k)),  # real tile
                pl.BlockSpec((B, TF), lambda c, k, t=tpc: (0, c * t + k)),  # fake tile
                pl.BlockSpec((TF, H), lambda c, k, t=tpc: (c * t + k, 0)),  # W1 tile (raw)
            ],
            out_specs=(
                pl.BlockSpec((None, B, H), lambda c, k: (c, 0, 0)),  # per-core pre partial
                pl.BlockSpec((None, H, H), lambda c, k: (c, 0, 0)),  # per-core Gram partial
            ),
        ),
        compiler_params=pltpu.CompilerParams(
            dimension_semantics=("parallel", "arbitrary"),
            vmem_limit_bytes=_VMEM_LIMIT,
        ),
    )(eps, real_flat, fake_flat, W1f)

    # Tiny epilogue (B x 32 and 32 x 32): combine per-core partials and apply
    # the closed-form WGAN-GP reduction.  grad_outputs == 1 =>
    #   dpre = relu'(pre) * W2^T ,  ||grad_b||^2 = dpre_b G dpre_b^T .
    pre = jnp.sum(pre_part, axis=0) + b1.astype(jnp.float32).reshape(1, H)
    gram = jnp.sum(gram_part, axis=0)
    w2row = W2.astype(jnp.float32).reshape(1, H)
    dpre = jnp.where(pre > 0.0, w2row, 0.0)                    # (B, H)
    sumsq = jnp.sum((dpre @ gram) * dpre, axis=1)              # (B,)
    return jnp.mean((jnp.sqrt(sumsq) - 1.0) ** 2)


# ---------------------------------------------------------------------------
# Pure-JAX reference (autodiff through the same fixed discriminator).
# ---------------------------------------------------------------------------
def _reference_gp(params, real, fake, key):
    W1, b1, W2, b2 = params
    B = real.shape[0]
    eps = jax.random.uniform(key, (B, 1), dtype=jnp.float32)
    rf = real.reshape(B, -1).astype(jnp.float32)
    ff = fake.reshape(B, -1).astype(jnp.float32)
    interp = eps * rf + (1.0 - eps) * ff

    def d_ref(x):
        return jnp.maximum(x @ W1 + b1, 0.0) @ W2 + b2

    _, vjp_fn = jax.vjp(d_ref, interp)
    (g,) = vjp_fn(jnp.ones((B, 1), jnp.float32))
    n = jnp.sqrt(jnp.sum(g * g, axis=1))
    return jnp.mean((n - 1.0) ** 2)


if __name__ == "__main__":
    def run_case(seed, B, C, Hs, Ws, HID):
        key = jax.random.PRNGKey(seed)
        k_real, k_fake, k_w1, k_b1, k_w2, k_b2, k_eps = jax.random.split(key, 7)
        F = C * Hs * Ws

        real = jax.random.normal(k_real, (B, C, Hs, Ws), dtype=jnp.float32)
        fake = jax.random.normal(k_fake, (B, C, Hs, Ws), dtype=jnp.float32)

        # Deterministic synthetic discriminator parameters (fixed 2-layer MLP).
        W1 = 0.05 * jax.random.normal(k_w1, (F, HID), dtype=jnp.float32)
        b1 = 0.01 * jax.random.normal(k_b1, (1, HID), dtype=jnp.float32)
        W2 = 0.05 * jax.random.normal(k_w2, (HID, 1), dtype=jnp.float32)
        b2 = 0.01 * jax.random.normal(k_b2, (1, 1), dtype=jnp.float32)
        params = (W1, b1, W2, b2)

        gp = jax.jit(gradient_penalty)(params, real, fake, k_eps)
        gp = jax.block_until_ready(gp)
        ref = jax.block_until_ready(_reference_gp(params, real, fake, k_eps))
        assert jnp.allclose(gp, ref, rtol=5e-4, atol=1e-5), (gp, ref)

    # F=1024: single F tile, single-core path.
    run_case(0, B=2, C=4, Hs=16, Ws=16, HID=32)
    # F=4096: multiple F tiles, exercises the 2-way "parallel" core split.
    run_case(1, B=2, C=4, Hs=32, Ws=32, HID=32)

    print("KERNEL_OK")
</pallas_src>

<mosaic_0001>
module attributes {stable_mosaic.version = 11 : i64} {
  func.func @_gp_fwd_gram_kernel(%arg0: i32, %arg1: i32, %arg2: memref<2x1xf32, #tpu.memory_space<vmem>>, %arg3: memref<2x1024xf32, #tpu.memory_space<vmem>>, %arg4: memref<2x1024xf32, #tpu.memory_space<vmem>>, %arg5: memref<1024x32xf32, #tpu.memory_space<vmem>>, %arg6: memref<1x2x32xf32, #tpu.memory_space<vmem>>, %arg7: memref<1x32x32xf32, #tpu.memory_space<vmem>>) attributes {dimension_semantics = [#tpu.dimension_semantics<parallel>, #tpu.dimension_semantics<arbitrary>], iteration_bounds = array<i64: 1, 1>, scalar_prefetch = 0 : i64, scratch_operands = 0 : i64, tpu.core_type = #tpu.core_type<tc>, window_params = [{pipeline_mode = #tpu.pipeline_mode<synchronous>, transform_indices = @transform_0, window_bounds = array<i64: 2, 1>}, {transform_indices = @transform_1, window_bounds = array<i64: 2, 1024>}, {transform_indices = @transform_2, window_bounds = array<i64: 2, 1024>}, {transform_indices = @transform_3, window_bounds = array<i64: 1024, 32>}, {transform_indices = @transform_4, window_bounds = array<i64: 1, 2, 32>}, {transform_indices = @transform_5, window_bounds = array<i64: 1, 32, 32>}]} {
    %c0_i32 = arith.constant 0 : i32
    %0 = arith.cmpi eq, %arg1, %c0_i32 : i32
    %1 = arith.extui %0 : i1 to i32
    %c0_i32_0 = arith.constant 0 : i32
    %2 = arith.cmpi ne, %1, %c0_i32_0 : i32
    scf.if %2 {
      %cst_22 = arith.constant 0.000000e+00 : f32
      %28 = vector.broadcast %cst_22 : f32 to vector<2x32xf32>
      %c0_23 = arith.constant 0 : index
      %c0_24 = arith.constant 0 : index
      %c0_25 = arith.constant 0 : index
      %29 = vector.load %arg6[%c0_23, %c0_24, %c0_25] : memref<1x2x32xf32, #tpu.memory_space<vmem>>, vector<1x2x32xf32>
      %30 = vector.shape_cast %29 : vector<1x2x32xf32> to vector<2x32xf32>
      %31 = vector.shape_cast %28 : vector<2x32xf32> to vector<1x2x32xf32>
      tpu.vector_store %arg6[%c0_23, %c0_24, %c0_25], %31 {strides = array<i32>} : memref<1x2x32xf32, #tpu.memory_space<vmem>>, vector<1x2x32xf32>,
      %cst_26 = arith.constant 0.000000e+00 : f32
      %32 = vector.broadcast %cst_26 : f32 to vector<32x32xf32>
      %c0_27 = arith.constant 0 : index
      %c0_28 = arith.constant 0 : index
      %c0_29 = arith.constant 0 : index
      %33 = vector.load %arg7[%c0_27, %c0_28, %c0_29] : memref<1x32x32xf32, #tpu.memory_space<vmem>>, vector<1x32x32xf32>
      %34 = vector.shape_cast %33 : vector<1x32x32xf32> to vector<32x32xf32>
      %35 = vector.shape_cast %32 : vector<32x32xf32> to vector<1x32x32xf32>
      tpu.vector_store %arg7[%c0_27, %c0_28, %c0_29], %35 {strides = array<i32>} : memref<1x32x32xf32, #tpu.memory_space<vmem>>, vector<1x32x32xf32>,
    } else {
    }
    %c0 = arith.constant 0 : index
    %c0_1 = arith.constant 0 : index
    %3 = vector.load %arg2[%c0, %c0_1] : memref<2x1xf32, #tpu.memory_space<vmem>>, vector<2x1xf32>
    %c0_2 = arith.constant 0 : index
    %c0_3 = arith.constant 0 : index
    %4 = vector.load %arg3[%c0_2, %c0_3] : memref<2x1024xf32, #tpu.memory_space<vmem>>, vector<2x1024xf32>
    %5 = vector.broadcast %3 : vector<2x1xf32> to vector<2x1024xf32>
    %6 = arith.mulf %5, %4 : vector<2x1024xf32>
    %cst = arith.constant 1.000000e+00 : f32
    %7 = vector.broadcast %cst : f32 to vector<2x1xf32>
    %8 = arith.subf %7, %3 : vector<2x1xf32>
    %c0_4 = arith.constant 0 : index
    %c0_5 = arith.constant 0 : index
    %9 = vector.load %arg4[%c0_4, %c0_5] : memref<2x1024xf32, #tpu.memory_space<vmem>>, vector<2x1024xf32>
    %10 = vector.broadcast %8 : vector<2x1xf32> to vector<2x1024xf32>
    %11 = arith.mulf %10, %9 : vector<2x1024xf32>
    %12 = arith.addf %6, %11 : vector<2x1024xf32>
    %c0_6 = arith.constant 0 : index
    %c0_7 = arith.constant 0 : index
    %13 = vector.load %arg5[%c0_6, %c0_7] : memref<1024x32xf32, #tpu.memory_space<vmem>>, vector<1024x32xf32>
    %c0_8 = arith.constant 0 : index
    %c0_9 = arith.constant 0 : index
    %c0_10 = arith.constant 0 : index
    %14 = vector.load %arg6[%c0_8, %c0_9, %c0_10] : memref<1x2x32xf32, #tpu.memory_space<vmem>>, vector<1x2x32xf32>
    %15 = vector.shape_cast %14 : vector<1x2x32xf32> to vector<2x32xf32>
    %cst_11 = arith.constant dense<0.000000e+00> : vector<2x32xf32>
    %16 = tpu.matmul %12, %13, %cst_11 {dimension_numbers = #tpu.dot_dimension_numbers<[1], [0], [0], [1], [0, 0, 1, 1], [], []>} : vector<2x1024xf32>, vector<1024x32xf32>, vector<2x32xf32> -> vector<2x32xf32>
    %17 = arith.addf %15, %16 : vector<2x32xf32>
    %c0_12 = arith.constant 0 : index
    %c0_13 = arith.constant 0 : index
    %c0_14 = arith.constant 0 : index
    %18 = vector.load %arg6[%c0_12, %c0_13, %c0_14] : memref<1x2x32xf32, #tpu.memory_space<vmem>>, vector<1x2x32xf32>
    %19 = vector.shape_cast %18 : vector<1x2x32xf32> to vector<2x32xf32>
    %20 = vector.shape_cast %17 : vector<2x32xf32> to vector<1x2x32xf32>
    tpu.vector_store %arg6[%c0_12, %c0_13, %c0_14], %20 {strides = array<i32>} : memref<1x2x32xf32, #tpu.memory_space<vmem>>, vector<1x2x32xf32>,
    %c0_15 = arith.constant 0 : index
    %c0_16 = arith.constant 0 : index
    %c0_17 = arith.constant 0 : index
    %21 = vector.load %arg7[%c0_15, %c0_16, %c0_17] : memref<1x32x32xf32, #tpu.memory_space<vmem>>, vector<1x32x32xf32>
    %22 = vector.shape_cast %21 : vector<1x32x32xf32> to vector<32x32xf32>
    %cst_18 = arith.constant dense<0.000000e+00> : vector<32x32xf32>
    %23 = tpu.matmul %13, %13, %cst_18 {dimension_numbers = #tpu.dot_dimension_numbers<[0], [0], [1], [1], [0, 1, 1, 1], [], []>} : vector<1024x32xf32>, vector<1024x32xf32>, vector<32x32xf32> -> vector<32x32xf32>
    %24 = arith.addf %22, %23 : vector<32x32xf32>
    %c0_19 = arith.constant 0 : index
    %c0_20 = arith.constant 0 : index
    %c0_21 = arith.constant 0 : index
    %25 = vector.load %arg7[%c0_19, %c0_20, %c0_21] : memref<1x32x32xf32, #tpu.memory_space<vmem>>, vector<1x32x32xf32>
    %26 = vector.shape_cast %25 : vector<1x32x32xf32> to vector<32x32xf32>
    %27 = vector.shape_cast %24 : vector<32x32xf32> to vector<1x32x32xf32>
    tpu.vector_store %arg7[%c0_19, %c0_20, %c0_21], %27 {strides = array<i32>} : memref<1x32x32xf32, #tpu.memory_space<vmem>>, vector<1x32x32xf32>,
    return
  }
  func.func @transform_0(%arg0: i32, %arg1: i32) -> (i32, i32) {
    %c0_i32 = arith.constant 0 : i32
    %c0_i32_0 = arith.constant 0 : i32
    %c0_i32_1 = arith.constant 0 : i32
    return %c0_i32, %c0_i32_0 : i32, i32
  }
  func.func @transform_1(%arg0: i32, %arg1: i32) -> (i32, i32) {
    %c1_i32 = arith.constant 1 : i32
    %0 = arith.muli %arg0, %c1_i32 : i32
    %1 = arith.addi %0, %arg1 : i32
    %c0_i32 = arith.constant 0 : i32
    %c0_i32_0 = arith.constant 0 : i32
    return %c0_i32, %1 : i32, i32
  }
  func.func @transform_2(%arg0: i32, %arg1: i32) -> (i32, i32) {
    %c1_i32 = arith.constant 1 : i32
    %0 = arith.muli %arg0, %c1_i32 : i32
    %1 = arith.addi %0, %arg1 : i32
    %c0_i32 = arith.constant 0 : i32
    %c0_i32_0 = arith.constant 0 : i32
    return %c0_i32, %1 : i32, i32
  }
  func.func @transform_3(%arg0: i32, %arg1: i32) -> (i32, i32) {
    %c1_i32 = arith.constant 1 : i32
    %0 = arith.muli %arg0, %c1_i32 : i32
    %1 = arith.addi %0, %arg1 : i32
    %c0_i32 = arith.constant 0 : i32
    %c0_i32_0 = arith.constant 0 : i32
    return %1, %c0_i32 : i32, i32
  }
  func.func @transform_4(%arg0: i32, %arg1: i32) -> (i32, i32, i32) {
    %c0_i32 = arith.constant 0 : i32
    %c0_i32_0 = arith.constant 0 : i32
    %c0_i32_1 = arith.constant 0 : i32
    return %arg0, %c0_i32, %c0_i32_0 : i32, i32, i32
  }
  func.func @transform_5(%arg0: i32, %arg1: i32) -> (i32, i32, i32) {
    %c0_i32 = arith.constant 0 : i32
    %c0_i32_0 = arith.constant 0 : i32
    %c0_i32_1 = arith.constant 0 : i32
    return %arg0, %c0_i32, %c0_i32_0 : i32, i32, i32
  }
}

</mosaic_0001>

<bundles_post_ra>
// kernel: gradient_penalty.1
= control target key start
LH: loop header
LB: loop body
LE: loop exit
PB: predicated region body
PF: predicated region fallthrough
CT: control target
= control target key end

     0   :  { %v2059_v0 = vmov 0   ;;  %vm89_vm0 = vcmask 254976   ;;  %vm91_vm1 = vcmask 261120   ;;  %s3301_s0 = inlined_call_operand.vmem [shape: f32[2,1], index: 0, kind: input, shape index: {}]   ;;  %s3302_s3 = inlined_call_operand.vmem [shape: f32[1024,32], index: 3, kind: input, shape index: {}]   ;;  %s3303_s1 = inlined_call_operand.vmem [shape: f32[2,1024], index: 1, kind: input, shape index: {}]   ;;  %s3304_s2 = inlined_call_operand.vmem [shape: f32[2,1024], index: 2, kind: input, shape index: {}]   ;;  %s3305_s4 = inlined_call_operand.vmem [shape: f32[1,2,32], index: 4, kind: output, shape index: {0}]   ;;  %s3306_s5 = inlined_call_operand.vmem [shape: f32[1,32,32], index: 5, kind: output, shape index: {1}]  }
   0x1   :  { %1846 = vset.pattern.permute.xlu0 %v2059_v0  ;;  %v96_v1 = vld [vmem:[%s3301_s0] sm:$0x3]  ;;  %v225_v6 = vld [vmem:[%s3302_s3 + $0x8] sm:$0xff]  ;;  %v226_v16 = vld [vmem:[%s3302_s3 + $0x10] sm:$0xff] }
   0x2   :  { %v224_v2 = vld [vmem:[%s3302_s3] sm:$0xff]  ;;  %101 = vperm.xlu0 %1846, %v96_v1   ;;  %v156_v4 = vsub.f32 1.0, %v96_v1  ;;  %v241_v8 = vld [vmem:[%s3302_s3 + $0x88] sm:$0xff]  ;;  %v242_v17 = vld [vmem:[%s3302_s3 + $0x90] sm:$0xff] }
   0x3   :  { %v240_v3 = vld [vmem:[%s3302_s3 + $0x80] sm:$0xff]  ;;  %v2115_v9 = vld [vmem:[%s3302_s3 + $0x188] sm:$0xff]  ;;  %v1849_v11 = vpack.i.bf16 %v225_v6, %v241_v8  ;;  %v2133_v15 = vpack.c.bf16 %v225_v6, %v224_v2  ;;  %v243_v18 = vld [vmem:[%s3302_s3 + $0x98] sm:$0xff]  ;;  %v1851_v26 = vpack.i.bf16 %v226_v16, %v242_v17 }
   0x4   :  { %v1847_v5 = vpack.i.bf16 %v224_v2, %v240_v3  ;;  %v2107_v7 = vld [vmem:[%s3302_s3 + $0x180] sm:$0xff]  ;;  %v2125_v12 = vld [vmem:[%s3302_s3 + $0x108] sm:$0xff]  ;;  %v2127_v13 = vpack.c.bf16 %v241_v8, %v240_v3  ;;  %v2151_v20 = vld [vmem:[%s3302_s3 + $0x190] sm:$0xff]  ;;  %v2153_v21 = vpack.c.bf16 %v243_v18, %v242_v17 }
   0x5   :  { %v2120_v10 = vld [vmem:[%s3302_s3 + $0x100] sm:$0xff]  ;;  %v2131_v14 = vpack.c.bf16 %v2115_v9, %v2107_v7  ;;  %3359 = vst [vmem:[#allocation4_spill] sm:$0xff] %v2133_v15  ;;  %v2158_v22 = vld [vmem:[%s3302_s3 + $0x198] sm:$0xff]  ;;  %v2163_v23 = vld [vmem:[%s3302_s3 + $0x110] sm:$0xff] }
   0x6   :  { %1848 = vxpose.xlu1.b32.start [1/16] (narrow) %v1847_v5, 32  ;;  %3357 = vst [vmem:[#allocation2_spill] sm:$0xff] %v2127_v13  ;;  %v2146_v19 = vpack.c.bf16 %v2125_v12, %v2120_v10  ;;  %161 = vperm.xlu0 %1846, %v156_v4   ;;  %3361 = vst [vmem:[#allocation6_spill] sm:$0xff] %v2153_v21  ;;  %v227_v24 = vld [vmem:[%s3302_s3 + $0x18] sm:$0xff]  ;;  %v2172_v25 = vpack.c.bf16 %v2158_v22, %v2151_v20  ;;  %v244_v29 = vld [vmem:[%s3302_s3 + $0xa0] sm:$0xff] }
   0x7   :  { %3358 = vst [vmem:[#allocation3_spill] sm:$0xff] %v2131_v14  ;;  %1588 = vmatprep.subr.bf16.mxu0 %v2127_v13  ;;  %1620 = vmatprep.subr.bf16.mxu1 %v2131_v14  ;;  %v2174_v27 = vpack.c.bf16 %v227_v24, %v226_v16  ;;  %v2179_v28 = vld [vmem:[%s3302_s3 + $0x118] sm:$0xff]  ;;  %v2187_v30 = vld [vmem:[%s3302_s3 + $0xa8] sm:$0xff]  ;;  %v2193_v31 = vld [vmem:[%s3302_s3 + $0x1a0] sm:$0xff]  ;;  %v1853_v39 = vpack.i.bf16 %v227_v24, %v243_v18 }
   0x8   :  { %3360 = vst [vmem:[#allocation5_spill] sm:$0xff] %v2146_v19  ;;  %3362 = vst [vmem:[#allocation7_spill] sm:$0xff] %v2172_v25  ;;  %1590 = vmatpush3.bf16.msra.mxu0 %v2133_v15  ;;  %v2196_v32 = vpack.c.bf16 %v2187_v30, %v244_v29  ;;  %v2201_v33 = vld [vmem:[%s3302_s3 + $0x1a8] sm:$0xff]  ;;  %1622 = vmatpush3.bf16.msra.mxu1 %v2146_v19  ;;  %v2207_v34 = vpack.c.bf16 %v2179_v28, %v2163_v23  ;;  %v228_v36 = vld [vmem:[%s3302_s3 + $0x20] sm:$0xff] }
   0x9   :  { %3363 = vst [vmem:[#allocation8_spill] sm:$0xff] %v2174_v27  ;;  %1592 = vmatprep.subr.bf16.mxu0 %v2153_v21  ;;  %1624 = vmatprep.subr.bf16.mxu1 %v2172_v25  ;;  %v2212_v35 = vpack.c.bf16 %v2201_v33, %v2193_v31  ;;  %v2220_v37 = vld [vmem:[%s3302_s3 + $0x120] sm:$0xff]  ;;  %v229_v38 = vld [vmem:[%s3302_s3 + $0x28] sm:$0xff]  ;;  %v2235_v42 = vld [vmem:[%s3302_s3 + $0xb0] sm:$0xff]  ;;  %v1855_v52 = vpack.i.bf16 %v228_v36, %v244_v29 }
   0xa   :  { %1850 = vxpose.xlu1.b32.cont [2/16] (narrow) %v1849_v11, 32  ;;  %3364 = vst [vmem:[#allocation9_spill] sm:$0xff] %v2196_v32  ;;  %3365 = vst [vmem:[#allocation10_spill] sm:$0xff] %v2207_v34  ;;  %v2225_v40 = vpack.c.bf16 %v229_v38, %v228_v36  ;;  %v2230_v41 = vld [vmem:[%s3302_s3 + $0x128] sm:$0xff]  ;;  %v2240_v43 = vld [vmem:[%s3302_s3 + $0xb8] sm:$0xff]  ;;  %v1857_v0 = vpack.i.bf16 %v229_v38, %v2187_v30 }
   0xb   :  { %3366 = vst [vmem:[#allocation11_spill] sm:$0xff] %v2212_v35  ;;  %v2246_v44 = vld [vmem:[%s3302_s3 + $0x1b0] sm:$0xff]  ;;  %v2250_v45 = vpack.c.bf16 %v2240_v43, %v2235_v42  ;;  %v2255_v46 = vld [vmem:[%s3302_s3 + $0x1b8] sm:$0xff]  ;;  %v2261_v47 = vpack.c.bf16 %v2230_v41, %v2220_v37  ;;  %v2295_v55 = vld [vmem:[%s3302_s3 + $0xc0] sm:$0xff] }
   0xc   :  { %3367 = vst [vmem:[#allocation12_spill] sm:$0xff] %v2225_v40  ;;  %1594 = vmatpush3.bf16.msra.mxu0 %v2174_v27  ;;  %1626 = vmatpush3.bf16.msra.mxu1 %v2207_v34  ;;  %v2266_v48 = vpack.c.bf16 %v2255_v46, %v2246_v44  ;;  %v2271_v49 = vld [vmem:[%s3302_s3 + $0x30] sm:$0xff]  ;;  %v2281_v51 = vld [vmem:[%s3302_s3 + $0x38] sm:$0xff]  ;;  %v2300_v56 = vld [vmem:[%s3302_s3 + $0xc8] sm:$0xff] }
   0xd   :  { %3368 = vst [vmem:[#allocation13_spill] sm:$0xff] %v2250_v45  ;;  %1596 = vmatprep.subr.bf16.mxu0 %v2196_v32  ;;  %3369 = vst [vmem:[#allocation14_spill] sm:$0xff] %v2261_v47  ;;  %1628 = vmatprep.subr.bf16.mxu1 %v2212_v35  ;;  %v2276_v50 = vld [vmem:[%s3302_s3 + $0x130] sm:$0xff]  ;;  %v2285_v53 = vpack.c.bf16 %v2281_v51, %v2271_v49  ;;  %v2290_v54 = vld [vmem:[%s3302_s3 + $0x138] sm:$0xff]  ;;  %v2310_v58 = vpack.c.bf16 %v2300_v56, %v2295_v55 }
   0xe   :  { %1852 = vxpose.xlu1.b32.cont [3/16] (narrow) %v1851_v26, 32  ;;  %3370 = vst [vmem:[#allocation15_spill] sm:$0xff] %v2266_v48  ;;  %v2306_v57 = vld [vmem:[%s3302_s3 + $0x1c0] sm:$0xff]  ;;  %v2315_v59 = vld [vmem:[%s3302_s3 + $0x1c8] sm:$0xff]  ;;  %v2321_v60 = vpack.c.bf16 %v2290_v54, %v2276_v50  ;;  %v2352_v3 = vld [vmem:[%s3302_s3 + $0xd0] sm:$0xff]  ;;  %v1859_v38 = vpack.i.bf16 %v2271_v49, %v2235_v42  ;;  %v1861_v27 = vpack.i.bf16 %v2281_v51, %v2240_v43 }
   0xf   :  { %3371 = vst [vmem:[#allocation16_spill] sm:$0xff] %v2285_v53  ;;  %3372 = vst [vmem:[#allocation17_spill] sm:$0xff] %v2310_v58  ;;  %v2326_v61 = vpack.c.bf16 %v2315_v59, %v2306_v57  ;;  %v2331_v62 = vld [vmem:[%s3302_s3 + $0x40] sm:$0xff]  ;;  %v2342_v1 = vld [vmem:[%s3302_s3 + $0x48] sm:$0xff] }
  0x10   :  { %1598 = vmatpush3.bf16.msra.mxu0 %v2225_v40  ;;  %1630 = vmatpush3.bf16.msra.mxu1 %v2261_v47  ;;  %3373 = vst [vmem:[#allocation18_spill] sm:$0xff] %v2321_v60  ;;  %v2336_v63 = vld [vmem:[%s3302_s3 + $0x140] sm:$0xff]  ;;  %v2347_v2 = vld [vmem:[%s3302_s3 + $0x148] sm:$0xff]  ;;  %v2357_v4 = vpack.c.bf16 %v2342_v1, %v2331_v62  ;;  %v2362_v5 = vld [vmem:[%s3302_s3 + $0x1d0] sm:$0xff] }
  0x11   :  { %1600 = vmatprep.subr.bf16.mxu0 %v2250_v45  ;;  %1632 = vmatprep.subr.bf16.mxu1 %v2266_v48  ;;  %3374 = vst [vmem:[#allocation19_spill] sm:$0xff] %v2326_v61  ;;  %v2367_v6 = vld [vmem:[%s3302_s3 + $0xd8] sm:$0xff]  ;;  %v2378_v11 = vpack.c.bf16 %v2347_v2, %v2336_v63  ;;  %v2383_v16 = vld [vmem:[%s3302_s3 + $0x50] sm:$0xff]  ;;  %v2412_v30 = vld [vmem:[%s3302_s3 + $0x200] sm:$0xff] }
  0x12   :  { %1854 = vxpose.xlu1.b32.cont [4/16] (narrow) %v1853_v39, 32  ;;  %3375 = vst [vmem:[#allocation20_spill] sm:$0xff] %v2357_v4  ;;  %v2372_v8 = vld [vmem:[%s3302_s3 + $0x1d8] sm:$0xff]  ;;  %v2388_v17 = vld [vmem:[%s3302_s3 + $0x150] sm:$0xff]  ;;  %v2397_v24 = vpack.c.bf16 %v2367_v6, %v2352_v3  ;;  %v2417_v36 = vld [vmem:[%s3302_s3 + $0x208] sm:$0xff] }
  0x13   :  { %3376 = vst [vmem:[#allocation21_spill] sm:$0xff] %v2378_v11  ;;  %v2393_v18 = vld [vmem:[%s3302_s3 + $0x58] sm:$0xff]  ;;  %v2402_v26 = vpack.c.bf16 %v2372_v8, %v2362_v5  ;;  %v2424_v39 = vld [vmem:[%s3302_s3 + $0xe0] sm:$0xff]  ;;  %v2447_v49 = vld [vmem:[%s3302_s3 + $0xe8] sm:$0xff] }
  0x14   :  { %1602 = vmatpush3.bf16.msra.mxu0 %v2285_v53  ;;  %1634 = vmatpush3.bf16.msra.mxu1 %v2321_v60  ;;  %3377 = vst [vmem:[#allocation22_spill] sm:$0xff] %v2397_v24  ;;  %v2407_v29 = vld [vmem:[%s3302_s3 + $0x158] sm:$0xff]  ;;  %v2442_v42 = vpack.c.bf16 %v2393_v18, %v2383_v16  ;;  %v2457_v60 = vld [vmem:[%s3302_s3 + $0x388] sm:$0xff]  ;;  %v2468_v48 = vld [vmem:[%s3302_s3 + $0x60] sm:$0xff] }
  0x15   :  { %1604 = vmatprep.subr.bf16.mxu0 %v2310_v58  ;;  %1636 = vmatprep.subr.bf16.mxu1 %v2326_v61  ;;  %3378 = vst [vmem:[#allocation23_spill] sm:$0xff] %v2402_v26  ;;  %v2433_v61 = vpack.c.bf16 %v2417_v36, %v2412_v30  ;;  %v2452_v58 = vld [vmem:[%s3302_s3 + $0x1e8] sm:$0xff]  ;;  %v2463_v53 = vpack.c.bf16 %v2407_v29, %v2388_v17  ;;  %v2473_v45 = vld [vmem:[%s3302_s3 + $0x160] sm:$0xff]  ;;  %v2489_v40 = vld [vmem:[%s3302_s3 + $0x210] sm:$0xff] }
  0x16   :  { %1856 = vxpose.xlu1.b32.cont [5/16] (narrow) %v1855_v52, 32  ;;  %v2429_v52 = vld [vmem:[%s3302_s3 + $0x1e0] sm:$0xff]  ;;  %3381 = vst [vmem:[#allocation26_spill] sm:$0xff] %v2442_v42  ;;  %v2494_v35 = vld [vmem:[%s3302_s3 + $0x218] sm:$0xff]  ;;  %v2505_v47 = vld [vmem:[%s3302_s3 + $0x168] sm:$0xff] }
  0x17   :  { %3379 = vst [vmem:[#allocation24_spill] sm:$0xff] %v2433_v61  ;;  %3382 = vst [vmem:[#allocation27_spill] sm:$0xff] %v2463_v53  ;;  %v2500_v32 = vpack.c.bf16 %v2452_v58, %v2429_v52  ;;  %v2510_v34 = vld [vmem:[%s3302_s3 + $0x290] sm:$0xff]  ;;  %v2536_v19 = vld [vmem:[%s3302_s3 + $0xf8] sm:$0xff]  ;;  %v2565_v13 = vpack.c.bf16 %v2505_v47, %v2473_v45  ;;  %v1899_v61 = vpack.i.bf16 %v2120_v10, %v2107_v7 }
  0x18   :  { %1606 = vmatpush3.bf16.msra.mxu0 %v2357_v4  ;;  %1638 = vmatpush3.bf16.msra.mxu1 %v2378_v11  ;;  %v2478_v4 = vld [vmem:[%s3302_s3 + $0x68] sm:$0xff]  ;;  %v2482_v11 = vpack.c.bf16 %v2447_v49, %v2424_v39  ;;  %v2526_v25 = vld [vmem:[%s3302_s3 + $0xf0] sm:$0xff]  ;;  %v2549_v51 = vld [vmem:[%s3302_s3 + $0x1f8] sm:$0xff] }
  0x19   :  { %1640 = vmatprep.subr.bf16.mxu1 %v2402_v26  ;;  %1608 = vmatprep.subr.bf16.mxu0 %v2397_v24  ;;  %3384 = vst [vmem:[#allocation29_spill] sm:$0xff] %v2500_v32  ;;  %v2515_v26 = vld [vmem:[%s3302_s3 + $0x298] sm:$0xff]  ;;  %v2519_v24 = vpack.c.bf16 %v2494_v35, %v2489_v40  ;;  %v2531_v21 = vld [vmem:[%s3302_s3 + $0x1f0] sm:$0xff]  ;;  %v2544_v43 = vpack.c.bf16 %v2478_v4, %v2468_v48  ;;  %3389 = vst [vmem:[#allocation34_spill] sm:$0xff] %v2549_v51 }
  0x1a   :  { %1858 = vxpose.xlu1.b32.cont [6/16] (narrow) %v1857_v0, 32  ;;  %v2438_v0 = vld [vmem:[%s3302_s3 + $0x308] sm:$0xff]  ;;  %3383 = vst [vmem:[#allocation28_spill] sm:$0xff] %v2482_v11  ;;  %3386 = vst [vmem:[#allocation31_spill] sm:$0xff] %v2531_v21  ;;  %v2554_v15 = vld [vmem:[%s3302_s3 + $0x220] sm:$0xff] }
  0x1b   :  { %3380 = vst [vmem:[#allocation25_spill] sm:$0xff] %v2438_v0  ;;  %3385 = vst [vmem:[#allocation30_spill] sm:$0xff] %v2519_v24  ;;  %v2559_v14 = vld [vmem:[%s3302_s3 + $0x228] sm:$0xff]  ;;  %v2569_v24 = vpack.c.bf16 %v2536_v19, %v2526_v25  ;;  %v1863_v0 = vpack.i.bf16 %v2331_v62, %v2295_v55  ;;  %v304_v7 = vld [vmem:[%s3302_s3 + $0x280] sm:$0xff] }
  0x1c   :  { %3388 = vst [vmem:[#allocation33_spill] sm:$0xff] %v2544_v43  ;;  %1610 = vmatpush3.bf16.msra.mxu0 %v2442_v42  ;;  %1642 = vmatpush3.bf16.msra.mxu1 %v2463_v53  ;;  %3390 = vst [vmem:[#allocation35_spill] sm:$0xff] %v2565_v13  ;;  %v2579_v42 = vpack.c.bf16 %v2549_v51, %v2531_v21  ;;  %v238_v53 = vld [vmem:[%s3302_s3 + $0x70] sm:$0xff]  ;;  %v305_v10 = vld [vmem:[%s3302_s3 + $0x288] sm:$0xff] }
  0x1d   :  { %3391 = vst [vmem:[#allocation36_spill] sm:$0xff] %v2569_v24  ;;  %1644 = vmatprep.subr.bf16.mxu1 %v2500_v32  ;;  %1612 = vmatprep.subr.bf16.mxu0 %v2482_v11  ;;  %v2591_v32 = vld [vmem:[%s3302_s3 + $0x170] sm:$0xff]  ;;  %v239_v11 = vld [vmem:[%s3302_s3 + $0x78] sm:$0xff]  ;;  %v2620_v62 = vpack.c.bf16 %v305_v10, %v304_v7 }
  0x1e   :  { %1860 = vxpose.xlu1.b32.cont [7/16] (narrow) %v1859_v38, 32  ;;  %v2540_v38 = vpack.c.bf16 %v2515_v26, %v2510_v34  ;;  %3393 = vst [vmem:[#allocation38_spill] sm:$0xff] %v2579_v42  ;;  %v2601_v51 = vpack.c.bf16 %v239_v11, %v238_v53 }
  0x1f   :  { %3396 = vst [vmem:[#allocation41_spill] sm:$0xff] %v2620_v62 }
  0x20   :  { %3387 = vst [vmem:[#allocation32_spill] sm:$0xff] %v2540_v38  ;;  %v2573_v38 = vpack.c.bf16 %v2559_v14, %v2554_v15  ;;  %3394 = vst [vmem:[#allocation39_spill] sm:$0xff] %v2601_v51  ;;  %1614 = vmatpush3.bf16.msra.mxu0 %v2544_v43  ;;  %1646 = vmatpush3.bf16.msra.mxu1 %v2565_v13  ;;  %v1901_v43 = vpack.i.bf16 %v2125_v12, %v2115_v9 }
  0x21   :  { %1648 = vmatprep.subr.bf16.mxu1 %v2579_v42  ;;  %1616 = vmatprep.subr.bf16.mxu0 %v2569_v24  ;;  %v1865_v13 = vpack.i.bf16 %v2342_v1, %v2300_v56  ;;  %v1903_v42 = vpack.i.bf16 %v2163_v23, %v2151_v20  ;;  %v1867_v9 = vpack.i.bf16 %v2383_v16, %v2352_v3  ;;  %v3399_v1 = vld [vmem:[#allocation34_spill] sm:$0xff]  ;;  %v2745_v16 = vld [vmem:[%s3302_s3 + $0x2c8] sm:$0xff] }
  0x22   :  { %3392 = vst [vmem:[#allocation37_spill] sm:$0xff] %v2573_v38  ;;  %1862 = vxpose.xlu1.b32.cont [8/16] (narrow) %v1861_v27, 32  ;;  %v2599_v38 = vld [vmem:[%s3302_s3 + $0x178] sm:$0xff]  ;;  %v2612_v27 = vld [vmem:[%s3302_s3 + $0x380] sm:$0xff]  ;;  %v1905_v12 = vpack.i.bf16 %v2179_v28, %v2158_v22  ;;  %v1869_v56 = vpack.i.bf16 %v2393_v18, %v2367_v6  ;;  %v1871_v20 = vpack.i.bf16 %v2468_v48, %v2424_v39 }
  0x23   :  { %v2618_v55 = vpack.c.bf16 %v2599_v38, %v2591_v32  ;;  %v2626_v21 = vpack.c.bf16 %v2457_v60, %v2612_v27  ;;  %v1873_v22 = vpack.i.bf16 %v2478_v4, %v2447_v49  ;;  %v1911_v23 = vpack.i.bf16 %v2276_v50, %v2246_v44  ;;  %v2721_v3 = vld [vmem:[%s3302_s3 + $0x300] sm:$0xff]  ;;  %v2784_v49 = vld [vmem:[%s3302_s3 + $0x398] sm:$0xff] }
  0x24   :  { %1900 = vxpose.xlu0.b32.start [1/16] (narrow) %v1899_v61, 32  ;;  %1618 = vmatpush3.bf16.msra.mxu0 %v2601_v51  ;;  %v1907_v61 = vpack.i.bf16 %v2220_v37, %v2193_v31  ;;  %v1875_v28 = vpack.i.bf16 %v238_v53, %v2526_v25  ;;  %v1913_v31 = vpack.i.bf16 %v2290_v54, %v2255_v46  ;;  %v2675_v53 = vld [vmem:[%s3302_s3 + $0x2a0] sm:$0xff] }
  0x25   :  { %3395 = vst [vmem:[#allocation40_spill] sm:$0xff] %v2618_v55  ;;  %3397 = vst [vmem:[#allocation42_spill] sm:$0xff] %v2626_v21  ;;  %1650 = vmatpush3.bf16.msra.mxu1 %v2618_v55  ;;  %1652 = vmatprep.subr.bf16.mxu0 %v2620_v62  ;;  %v1877_v37 = vpack.i.bf16 %v239_v11, %v2536_v19  ;;  %v1917_v44 = vpack.i.bf16 %v2347_v2, %v2315_v59  ;;  %v3398_v59 = vld [vmem:[#allocation31_spill] sm:$0xff]  ;;  %v2726_v4 = vld [vmem:[%s3302_s3 + $0x240] sm:$0xff] }
  0x26   :  { %1864 = vxpose.xlu1.b32.cont [9/16] (narrow) %v1863_v0, 32  ;;  %1684 = vmatprep.subr.bf16.mxu1 %v2626_v21  ;;  %v1953_v25 = vpack.i.bf16 %v2417_v36, %v305_v10  ;;  %v1919_v46 = vpack.i.bf16 %v2388_v17, %v2362_v5  ;;  %v1955_v19 = vpack.i.bf16 %v2489_v40, %v2510_v34  ;;  %v2684_v40 = vld [vmem:[%s3302_s3 + $0x2a8] sm:$0xff]  ;;  %v2731_v5 = vld [vmem:[%s3302_s3 + $0x2c0] sm:$0xff]  ;;  %v2750_v17 = vld [vmem:[%s3302_s3 + $0x310] sm:$0xff] }
  0x27   :  { %v1921_v48 = vpack.i.bf16 %v2407_v29, %v2372_v8  ;;  %v1957_v50 = vpack.i.bf16 %v2494_v35, %v2515_v26  ;;  %v1923_v54 = vpack.i.bf16 %v2473_v45, %v2429_v52  ;;  %v1959_v34 = vpack.i.bf16 %v2554_v15, %v2675_v53  ;;  %v2693_v45 = vld [vmem:[%s3302_s3 + $0x230] sm:$0xff]  ;;  %v2740_v11 = vld [vmem:[%s3302_s3 + $0x248] sm:$0xff]  ;;  %v3400_v36 = vld [vmem:[#allocation25_spill] sm:$0xff] }
  0x28   :  { %1902 = vxpose.xlu0.b32.cont [2/16] (narrow) %v1901_v43, 32  ;;  %v1925_v35 = vpack.i.bf16 %v2505_v47, %v2452_v58  ;;  %v2698_v15 = vld [vmem:[%s3302_s3 + $0x2b0] sm:$0xff]  ;;  %v2712_v58 = vld [vmem:[%s3302_s3 + $0x2b8] sm:$0xff]  ;;  %v1929_v2 = vpack.i.bf16 %v2599_v38, %v3399_v1  ;;  %v2003_v6 = vpack.i.bf16 %v2721_v3, %v2612_v27  ;;  %v1967_v8 = vpack.i.bf16 %v2726_v4, %v2731_v5  ;;  %v2808_v27 = vld [vmem:[%s3302_s3 + $0x3a0] sm:$0xff] }
  0x29   :  { %v1963_v47 = vpack.i.bf16 %v2693_v45, %v2698_v15  ;;  %v1969_v18 = vpack.i.bf16 %v2740_v11, %v2745_v16  ;;  %v2757_v26 = vld [vmem:[%s3302_s3 + $0x390] sm:$0xff]  ;;  %v3401_v39 = vpack.i.bf16 %v3400_v36, %v2457_v60  ;;  %v2777_v0 = vld [vmem:[%s3302_s3 + $0x318] sm:$0xff] }
  0x2a   :  { %1866 = vxpose.xlu1.b32.cont [10/16] (narrow) %v1865_v13, 32  ;;  %v1909_v13 = vpack.i.bf16 %v2230_v41, %v2201_v33  ;;  %v1915_v33 = vpack.i.bf16 %v2336_v63, %v2306_v57  ;;  %v1951_v41 = vpack.i.bf16 %v2412_v30, %v304_v7  ;;  %v1961_v57 = vpack.i.bf16 %v2559_v14, %v2684_v40  ;;  %v2707_v14 = vld [vmem:[%s3302_s3 + $0x238] sm:$0xff]  ;;  %v2762_v29 = vld [vmem:[%s3302_s3 + $0x250] sm:$0xff]  ;;  %v2801_v7 = vld [vmem:[%s3302_s3 + $0x320] sm:$0xff] }
  0x2b   :  { %v1927_v63 = vpack.i.bf16 %v2591_v32, %v3398_v59  ;;  %v1965_v32 = vpack.i.bf16 %v2707_v14, %v2712_v58  ;;  %v2767_v30 = vld [vmem:[%s3302_s3 + $0x2d0] sm:$0xff]  ;;  %v2007_v52 = vpack.i.bf16 %v2750_v17, %v2757_v26  ;;  %v2789_v60 = vld [vmem:[%s3302_s3 + $0x258] sm:$0xff]  ;;  %v2009_v43 = vpack.i.bf16 %v2777_v0, %v2784_v49 }
  0x2c   :  { %1904 = vxpose.xlu0.b32.cont [3/16] (narrow) %v1903_v42, 32  ;;  %v1971_v42 = vpack.i.bf16 %v2762_v29, %v2767_v30  ;;  %v2794_v38 = vld [vmem:[%s3302_s3 + $0x2d8] sm:$0xff] }
  0x2d   :  { %v1973_v10 = vpack.i.bf16 %v2789_v60, %v2794_v38  ;;  %v2879_v59 = vld [vmem:[%s3302_s3 + $0x338] sm:$0xff] }
  0x2e   :  { %1868 = vxpose.xlu1.b32.cont [11/16] (narrow) %v1867_v9, 32  ;;  %v2813_v9 = vld [vmem:[%s3302_s3 + $0x260] sm:$0xff] }
  0x30   :  { %1906 = vxpose.xlu0.b32.cont [4/16] (narrow) %v1905_v12, 32  ;;  %v2818_v12 = vld [vmem:[%s3302_s3 + $0x2e0] sm:$0xff] }
  0x32   :  { %1870 = vxpose.xlu1.b32.cont [12/16] (narrow) %v1869_v56, 32  ;;  %v2060_v56 = vmov 1983009808  }
  0x34   :  { %1908 = vxpose.xlu0.b32.cont [5/16] (narrow) %v1907_v61, 32  ;;  %v108_v61 = vunpack.c.l.s4 %v2060_v56 }
  0x36   :  { %1872 = vxpose.xlu1.b32.cont [13/16] (narrow) %v1871_v20, 32  ;;  %v110_v20 = vlaneseq }
  0x38   :  { %1910 = vxpose.xlu0.b32.cont [6/16] (narrow) %v1909_v13, 32  ;;  %v2011_v13 = vpack.i.bf16 %v2801_v7, %v2808_v27 }
  0x3a   :  { %1874 = vxpose.xlu1.b32.cont [14/16] (narrow) %v1873_v22, 32  ;;  %v2825_v22 = vld [vmem:[%s3302_s3 + $0x328] sm:$0xff] }
  0x3c   :  { %1912 = vxpose.xlu0.b32.cont [7/16] (narrow) %v1911_v23, 32  ;;  %v1975_v23 = vpack.i.bf16 %v2813_v9, %v2818_v12 }
  0x3e   :  { %1876 = vxpose.xlu1.b32.cont [15/16] (narrow) %v1875_v28, 32  ;;  %v2832_v28 = vld [vmem:[%s3302_s3 + $0x3a8] sm:$0xff] }
  0x40   :  { %1914 = vxpose.xlu0.b32.cont [8/16] (narrow) %v1913_v31, 32  ;;  %v2837_v31 = vld [vmem:[%s3302_s3 + $0x268] sm:$0xff] }
  0x42   :  { %1878 = vxpose.xlu1.b32.end [16/16] (narrow) %v1877_v37, 32  ;;  %v2842_v37 = vld [vmem:[%s3302_s3 + $0x2e8] sm:$0xff] }
  0x44   :  { %1916 = vxpose.xlu0.b32.cont [9/16] (narrow) %v1915_v33, 32  ;;  %v109_v33 = vunpack.c.0.s8 %v108_v61 }
  0x46   :  { %1952 = vxpose.xlu1.b32.start [1/16] (narrow) %v1951_v41, 32  ;;  %v111_v41 = vshrl.u32 %v110_v20, 7 }
  0x48   :  { %1918 = vxpose.xlu0.b32.cont [10/16] (narrow) %v1917_v44, 32  ;;  %v2013_v44 = vpack.i.bf16 %v2825_v22, %v2832_v28 }
  0x4a   :  { %1954 = vxpose.xlu1.b32.cont [2/16] (narrow) %v1953_v25, 32  ;;  %v2849_v25 = vld [vmem:[%s3302_s3 + $0x330] sm:$0xff] }
  0x4c   :  { %1920 = vxpose.xlu0.b32.cont [11/16] (narrow) %v1919_v46, 32  ;;  %v2854_v46 = vld [vmem:[%s3302_s3 + $0x3b0] sm:$0xff] }
  0x4e   :  { %1956 = vxpose.xlu1.b32.cont [3/16] (narrow) %v1955_v19, 32  ;;  %v1977_v19 = vpack.i.bf16 %v2837_v31, %v2842_v37 }
  0x50   :  { %1922 = vxpose.xlu0.b32.cont [12/16] (narrow) %v1921_v48, 32  ;;  %v97_v48 = vld [vmem:[%s3303_s1] sm:$0xff] }
  0x51   :  { %v106_v1 = vcombine.high %v97_v48, %v97_v48 }
  0x52   :  { %1958 = vxpose.xlu1.b32.cont [4/16] (narrow) %v1957_v50, 32  ;;  %v2864_v50 = vld [vmem:[%s3302_s3 + $0x270] sm:$0xff] }
  0x54   :  { %1924 = vxpose.xlu0.b32.cont [13/16] (narrow) %v1923_v54, 32  ;;  %v2869_v54 = vld [vmem:[%s3302_s3 + $0x2f0] sm:$0xff] }
  0x56   :  { %1960 = vxpose.xlu1.b32.cont [5/16] (narrow) %v1959_v34, 32  ;;  %v112_v34 = vsub.s32 %v109_v33, %v111_v41 }
  0x58   :  { %1926 = vxpose.xlu0.b32.cont [14/16] (narrow) %v1925_v35, 32  ;;  %v157_v35 = vld [vmem:[%s3304_s2] sm:$0xff]  ;;  %v120_v61 = vrot.slane %v106_v1, %v112_v34 }
  0x5a   :  { %1962 = vxpose.xlu1.b32.cont [6/16] (narrow) %v1961_v57, 32  ;;  %v2015_v57 = vpack.i.bf16 %v2849_v25, %v2854_v46 }
  0x5c   :  { %1928 = vxpose.xlu0.b32.cont [15/16] (narrow) %v1927_v63, 32  ;;  %v2884_v63 = vld [vmem:[%s3302_s3 + $0x3b8] sm:$0xff] }
  0x5e   :  { %1964 = vxpose.xlu1.b32.cont [7/16] (narrow) %v1963_v47, 32  ;;  %v158_v47 = vld [vmem:[%s3304_s2 + $0x8] sm:$0xff] }
  0x60   :  { %1930 = vxpose.xlu0.b32.end [16/16] (narrow) %v1929_v2, 32  ;;  %v1979_v2 = vpack.i.bf16 %v2864_v50, %v2869_v54 }
  0x62   :  { %1966 = vxpose.xlu1.b32.cont [8/16] (narrow) %v1965_v32, 32  ;;  %v98_v32 = vld [vmem:[%s3303_s1 + $0x8] sm:$0xff] }
  0x63   :  { %v123_v56 = vcombine.high %v98_v32, %v98_v32  ;;  %v2934_v1 = vrot.slane %v98_v32, %v112_v34 }
  0x64   :  { %2004 = vxpose.xlu0.b32.start [1/16] (narrow) %v2003_v6, 32  ;;  %v2897_v6 = vld [vmem:[%s3302_s3 + $0x278] sm:$0xff] }
  0x65   :  { %3402 = vst [vmem:[#allocation31_spill] sm:$0xff] %v2897_v6  ;;  %3405 = vst [vmem:[#allocation43_spill] sm:$0xff] %v2934_v1 }
  0x66   :  { %1968 = vxpose.xlu1.b32.cont [9/16] (narrow) %v1967_v8, 32  ;;  %v2902_v8 = vld [vmem:[%s3302_s3 + $0x2f8] sm:$0xff] }
  0x67   :  { %v1981_v20 = vpack.i.bf16 %v2897_v6, %v2902_v8 }
  0x68   :  { %2006 = vxpose.xlu0.b32.cont [2/16] (narrow) %v3401_v39, 32  ;;  %v2017_v39 = vpack.i.bf16 %v2879_v59, %v2884_v63 }
  0x6a   :  { %1970 = vxpose.xlu1.b32.cont [10/16] (narrow) %v1969_v18, 32  ;;  %v166_v18 = vcombine.high %v157_v35, %v157_v35 }
  0x6c   :  { %2008 = vxpose.xlu0.b32.cont [3/16] (narrow) %v2007_v52, 32  ;;  %v113_v52 = vrot.slane %v97_v48, %v112_v34  ;;  %v2927_v48 = vld [vmem:[%s3302_s3 + $0x348] sm:$0xff] }
  0x6e   :  { %1972 = vxpose.xlu1.b32.cont [11/16] (narrow) %v1971_v42, 32  ;;  %v183_v42 = vcombine.high %v158_v47, %v158_v47  ;;  %v121_v41 = vcombine.high %v113_v52, %v113_v52 }
  0x70   :  { %2010 = vxpose.xlu0.b32.cont [4/16] (narrow) %v2009_v43, 32  ;;  %v2909_v43 = vld [vmem:[%s3302_s3 + $0x340] sm:$0xff] }
  0x72   :  { %1974 = vxpose.xlu1.b32.cont [12/16] (narrow) %v1973_v10, 32  ;;  %v2914_v10 = vld [vmem:[%s3302_s3 + $0x3c0] sm:$0xff] }
  0x73   :  { %v2019_v33 = vpack.i.bf16 %v2909_v43, %v2914_v10 }
  0x74   :  { %2012 = vxpose.xlu0.b32.cont [5/16] (narrow) %v2011_v13, 32  ;;  %v173_v13 = vrot.slane %v157_v35, %v112_v34  ;;  %v122_v35 = vcombine.high %v120_v61, %v120_v61 }
  0x76   :  { %1976 = vxpose.xlu1.b32.cont [13/16] (narrow) %v1975_v23, 32  ;;  %v180_v23 = vrot.slane %v166_v18, %v112_v34  ;;  %v181_v18 = vcombine.high %v173_v13, %v173_v13 }
  0x78   :  { %2014 = vxpose.xlu0.b32.cont [6/16] (narrow) %v2013_v44, 32  ;;  %v2920_v44 = vrot.slane %v158_v47, %v112_v34 }
  0x7a   :  { %1978 = vxpose.xlu1.b32.cont [14/16] (narrow) %v1977_v19, 32  ;;  %3403 = vst [vmem:[#allocation34_spill] sm:$0xff] %v2920_v44  ;;  %v2922_v19 = vrot.slane %v183_v42, %v112_v34  ;;  %v198_v21 = vcombine.high %v2920_v44, %v2920_v44 }
  0x7c   :  { %2016 = vxpose.xlu0.b32.cont [7/16] (narrow) %v2015_v57, 32  ;;  %3404 = vst [vmem:[#allocation25_spill] sm:$0xff] %v2922_v19  ;;  %v2932_v57 = vld [vmem:[%s3302_s3 + $0x3c8] sm:$0xff]  ;;  %v199_v62 = vcombine.high %v2922_v19, %v2922_v19 }
  0x7d   :  { %v2021_v42 = vpack.i.bf16 %v2927_v48, %v2932_v57 }
  0x7e   :  { %1980 = vxpose.xlu1.b32.cont [15/16] (narrow) %v1979_v2, 32  ;;  %v2936_v2 = vrot.slane %v123_v56, %v112_v34  ;;  %v138_v56 = vcombine.high %v2934_v1, %v2934_v1  ;;  %v2964_v1 = vpack.c.bf16 %v3400_v36, %v2721_v3 }
  0x80   :  { %2018 = vxpose.xlu0.b32.cont [8/16] (narrow) %v2017_v39, 32  ;;  %3406 = vst [vmem:[#allocation44_spill] sm:$0xff] %v2936_v2  ;;  %v182_v39 = vcombine.high %v180_v23, %v180_v23 }
  0x81   :  { %v2938_v47 = vpop.permute.xlu0 %101 }
  0x82   :  { %1982 = vxpose.xlu1.b32.end [16/16] (narrow) %v1981_v20, 32  ;;  %v149_v32 = vmul.f32 %v121_v41, %v2938_v47  ;;  %v151_v34 = vmul.f32 %v122_v35, %v2938_v47  ;;  %v139_v20 = vcombine.high %v2936_v2, %v2936_v2  ;;  %v148_v24 = vmul.f32 %v113_v52, %v2938_v47  ;;  %v2971_v52 = vld [vmem:[%s3302_s3 + $0x350] sm:$0xff] }
  0x83   :  { %v150_v44 = vmul.f32 %v120_v61, %v2938_v47  ;;  %v2976_v61 = vld [vmem:[%s3302_s3 + $0x3d0] sm:$0xff] }
  0x84   :  { %2020 = vxpose.xlu0.b32.cont [9/16] (narrow) %v2019_v33, 32 }
  0x85   :  { %v2954_v51 = vpop.permute.xlu0 %161 }
  0x86   :  { %v2952_v55 = vpop.trf.xlu1  ;;  %3408 = vst [vmem:[#allocation46_spill] sm:$0xff] %v2954_v51  ;;  %v209_v33 = vmul.f32 %v181_v18, %v2954_v51  ;;  %v211_v41 = vmul.f32 %v182_v39, %v2954_v51  ;;  %v208_v35 = vmul.f32 %v173_v13, %v2954_v51  ;;  %v210_v19 = vmul.f32 %v180_v23, %v2954_v51 }
  0x87   :  { %3407 = vst [vmem:[#allocation45_spill] sm:$0xff] %v2952_v55  ;;  %v213_v55 = vmul.f32 %v198_v21, %v2954_v51  ;;  %v215_v2 = vmul.f32 %v199_v62, %v2954_v51  ;;  %v153_v21 = vmul.f32 %v138_v56, %v2938_v47  ;;  %v155_v62 = vmul.f32 %v139_v20, %v2938_v47 }
  0x88   :  { %2022 = vxpose.xlu0.b32.cont [10/16] (narrow) %v2021_v42, 32  ;;  %v217_v13 = vadd.f32 %v209_v33, %v149_v32  ;;  %v219_v23 = vadd.f32 %v211_v41, %v151_v34  ;;  %v216_v18 = vadd.f32 %v208_v35, %v148_v24  ;;  %v218_v3 = vadd.f32 %v210_v19, %v150_v44  ;;  %v331_v24 = vld [vmem:[%s3302_s3 + $0x358] sm:$0xff]  ;;  %v3409_v19 = vld [vmem:[#allocation24_spill] sm:$0xff] }
  0x89   :  { %v2023_v39 = vpack.i.bf16 %v2971_v52, %v2976_v61  ;;  %v221_v51 = vadd.f32 %v213_v55, %v153_v21  ;;  %v223_v6 = vadd.f32 %v215_v2, %v155_v62  ;;  %v2986_v42 = vpack.c.bf16 %v2784_v49, %v2757_v26  ;;  %v347_v44 = vld [vmem:[%s3302_s3 + $0x3d8] sm:$0xff]  ;;  %v3410_v32 = vld [vmem:[#allocation32_spill] sm:$0xff] }
  0x8a   :  { %v2978_v36 = vpop.trf.xlu1  ;;  %417 = vmatprep.mubr.f32.mxu0 %v217_v13  ;;  %487 = vmatprep.mubr.f32.mxu1 %v219_v23  ;;  %v2998_v55 = vpack.c.bf16 %v2777_v0, %v2750_v17  ;;  %v3004_v26 = vpack.c.bf16 %v2684_v40, %v2675_v53  ;;  %v3008_v49 = vpack.c.bf16 %v2832_v28, %v2808_v27  ;;  %v332_v17 = vld [vmem:[%s3302_s3 + $0x360] sm:$0xff]  ;;  %v3418_v23 = vld [vmem:[#allocation44_spill] sm:$0xff] }
  0x8b   :  { %418 = vmatmul.mubr.f32.vlgmr.msra.gmra.mrb[0].mxu0 %v216_v18  ;;  %488 = vmatmul.mubr.f32.vlgmr.msra.gmra.mrb[0].mxu1 %v218_v3  ;;  %v2025_v34 = vpack.i.bf16 %v331_v24, %v347_v44  ;;  %v3411_v53 = vld [vmem:[#allocation30_spill] sm:$0xff]  ;;  %v3022_v40 = vpack.c.bf16 %v2825_v22, %v2801_v7  ;;  %v3030_v27 = vpack.c.bf16 %v2712_v58, %v2698_v15  ;;  %v333_v7 = vld [vmem:[%s3302_s3 + $0x368] sm:$0xff]  ;;  %v3412_v15 = vld [vmem:[#allocation37_spill] sm:$0xff] }
  0x8c   :  { %1654 = vmatpush3.bf16.msra.mxu0 %v3409_v19  ;;  %1686 = vmatpush3.bf16.msra.mxu1 %v2964_v1  ;;  %v3034_v28 = vpack.c.bf16 %v2884_v63, %v2854_v46  ;;  %v349_v22 = vld [vmem:[%s3302_s3 + $0x3e8] sm:$0xff]  ;;  %v3044_v56 = vpack.c.bf16 %v2707_v14, %v2693_v45  ;;  %v3050_v58 = vpack.c.bf16 %v2879_v59, %v2849_v25  ;;  %v334_v63 = vld [vmem:[%s3302_s3 + $0x370] sm:$0xff] }
  0x8d   :  { %557 = vmatprep.mubr.f32.mxu0 %v221_v51  ;;  %627 = vmatprep.mubr.f32.mxu1 %v223_v6  ;;  %v348_v51 = vld [vmem:[%s3302_s3 + $0x3e0] sm:$0xff]  ;;  %v3056_v46 = vpack.c.bf16 %v2745_v16, %v2731_v5  ;;  %v3060_v45 = vpack.c.bf16 %v2932_v57, %v2914_v10  ;;  %v2029_v14 = vpack.i.bf16 %v333_v7, %v349_v22  ;;  %v350_v25 = vld [vmem:[%s3302_s3 + $0x3f0] sm:$0xff] }
  0x8e   :  { %v3000_v2 = vpop.trf.xlu1  ;;  %2024 = vxpose.xlu0.b32.cont [11/16] (narrow) %v2023_v39, 32  ;;  %1656 = vmatprep.subr.bf16.mxu0 %v3410_v32  ;;  %v2027_v6 = vpack.i.bf16 %v332_v17, %v348_v51  ;;  %v3070_v59 = vpack.c.bf16 %v2740_v11, %v2726_v4  ;;  %v3076_v5 = vpack.c.bf16 %v2927_v48, %v2909_v43  ;;  %v335_v11 = vld [vmem:[%s3302_s3 + $0x378] sm:$0xff]  ;;  %v3419_v39 = vld [vmem:[#allocation2_spill] sm:$0xff] }
  0x8f   :  { %1688 = vmatprep.subr.bf16.mxu1 %v2986_v42  ;;  %v3082_v16 = vpack.c.bf16 %v2794_v38, %v2767_v30  ;;  %v3085_v10 = vpack.c.bf16 %v347_v44, %v2976_v61  ;;  %v2031_v4 = vpack.i.bf16 %v334_v63, %v350_v25  ;;  %v351_v43 = vld [vmem:[%s3302_s3 + $0x3f8] sm:$0xff]  ;;  %v3095_v48 = vpack.c.bf16 %v2789_v60, %v2762_v29 }
  0x90   :  { %1658 = vmatpush3.bf16.msra.mxu0 %v3411_v53  ;;  %1690 = vmatpush3.bf16.msra.mxu1 %v2998_v55  ;;  %v3100_v30 = vpack.c.bf16 %v331_v24, %v2971_v52  ;;  %v3106_v38 = vpack.c.bf16 %v2842_v37, %v2818_v12  ;;  %v3108_v57 = vpack.c.bf16 %v349_v22, %v348_v51  ;;  %v3416_v52 = vld [vmem:[#allocation25_spill] sm:$0xff]  ;;  %v3420_v24 = vld [vmem:[#allocation3_spill] sm:$0xff]  ;;  %v3422_v51 = vld [vmem:[#allocation4_spill] sm:$0xff] }
  0x91   :  { %1660 = vmatprep.subr.bf16.mxu0 %v3004_v26  ;;  %1692 = vmatprep.subr.bf16.mxu1 %v3008_v49  ;;  %v2033_v29 = vpack.i.bf16 %v335_v11, %v351_v43  ;;  %v3112_v60 = vpack.c.bf16 %v2837_v31, %v2813_v9  ;;  %v3116_v20 = vpack.c.bf16 %v333_v7, %v332_v17  ;;  %v3413_v9 = vld [vmem:[#allocation31_spill] sm:$0xff]  ;;  %v3421_v44 = vld [vmem:[#allocation45_spill] sm:$0xff]  ;;  %v3424_v7 = vld [vmem:[#allocation6_spill] sm:$0xff] }
  0x92   :  { %v3024_v0 = vpop.trf.xlu1  ;;  %2026 = vxpose.xlu0.b32.cont [12/16] (narrow) %v2025_v34, 32  ;;  %v3122_v12 = vpack.c.bf16 %v2902_v8, %v2869_v54  ;;  %v3124_v37 = vpack.c.bf16 %v351_v43, %v350_v25  ;;  %v3128_v31 = vpack.c.bf16 %v3413_v9, %v2864_v50  ;;  %v3132_v33 = vpack.c.bf16 %v335_v11, %v334_v63  ;;  %v3414_v54 = vld [vmem:[#allocation46_spill] sm:$0xff]  ;;  %v3417_v50 = vld [vmem:[#allocation43_spill] sm:$0xff]  ;;  %v3430_v43 = vld [vmem:[#allocation12_spill] sm:$0xff] }
  0x93   :  { %v3415_v8 = vld [vmem:[#allocation34_spill] sm:$0xff]  ;;  %v214_v61 = vmul.f32 %v3416_v52, %v3414_v54  ;;  %v152_v13 = vmul.f32 %v3417_v50, %v2938_v47  ;;  %v154_v18 = vmul.f32 %v3418_v23, %v2938_v47  ;;  %v1880_v34 = vunpack.i.l.bf16 %v3421_v44  ;;  %v3423_v47 = vld [vmem:[#allocation5_spill] sm:$0xff]  ;;  %v3425_v22 = vld [vmem:[#allocation7_spill] sm:$0xff] }
  0x94   :  { %1662 = vmatpush3.bf16.msra.mxu0 %v3412_v15  ;;  %1694 = vmatpush3.bf16.msra.mxu1 %v3022_v40  ;;  %v212_v35 = vmul.f32 %v3415_v8, %v3414_v54  ;;  %v3427_v63 = vld [vmem:[#allocation10_spill] sm:$0xff]  ;;  %v3429_v11 = vld [vmem:[#allocation11_spill] sm:$0xff]  ;;  %v3432_v9 = vld [vmem:[#allocation13_spill] sm:$0xff] }
  0x95   :  { %1664 = vmatprep.subr.bf16.mxu0 %v3030_v27  ;;  %1696 = vmatprep.subr.bf16.mxu1 %v3034_v28  ;;  %v222_v62 = vadd.f32 %v214_v61, %v154_v18  ;;  %v3433_v54 = vld [vmem:[#allocation15_spill] sm:$0xff]  ;;  %v3434_v8 = vld [vmem:[#allocation16_spill] sm:$0xff]  ;;  %v3436_v52 = vld [vmem:[#allocation17_spill] sm:$0xff] }
  0x96   :  { %2028 = vxpose.xlu0.b32.cont [13/16] (narrow) %v2027_v6, 32  ;;  %v220_v21 = vadd.f32 %v212_v35, %v152_v13  ;;  %v3435_v35 = vld [vmem:[#allocation18_spill] sm:$0xff]  ;;  %v3437_v61 = vld [vmem:[#allocation19_spill] sm:$0xff]  ;;  %v3438_v50 = vld [vmem:[#allocation20_spill] sm:$0xff] }
  0x97   :  { %v3439_v13 = vld [vmem:[#allocation21_spill] sm:$0xff]  ;;  %v3440_v23 = vld [vmem:[#allocation22_spill] sm:$0xff]  ;;  %v3441_v18 = vld [vmem:[#allocation23_spill] sm:$0xff] }
  0x98   :  { %1666 = vmatpush3.bf16.msra.mxu0 %v3044_v56  ;;  %1698 = vmatpush3.bf16.msra.mxu1 %v3050_v58 }
  0x99   :  { %1668 = vmatprep.subr.bf16.mxu0 %v3056_v46  ;;  %1700 = vmatprep.subr.bf16.mxu1 %v3060_v45 }
  0x9a   :  { %2030 = vxpose.xlu0.b32.cont [14/16] (narrow) %v2029_v14, 32  ;;  %v3426_v14 = vld [vmem:[#allocation8_spill] sm:$0xff] }
  0x9c   :  { %1670 = vmatpush3.bf16.msra.mxu0 %v3070_v59  ;;  %1702 = vmatpush3.bf16.msra.mxu1 %v3076_v5 }
  0x9d   :  { %1672 = vmatprep.subr.bf16.mxu0 %v3082_v16  ;;  %1704 = vmatprep.subr.bf16.mxu1 %v3085_v10 }
  0x9e   :  { %2032 = vxpose.xlu0.b32.cont [15/16] (narrow) %v2031_v4, 32  ;;  %v3428_v4 = vld [vmem:[#allocation9_spill] sm:$0xff] }
  0xa0   :  { %1674 = vmatpush3.bf16.msra.mxu0 %v3095_v48  ;;  %1706 = vmatpush3.bf16.msra.mxu1 %v3100_v30 }
  0xa1   :  { %1676 = vmatprep.subr.bf16.mxu0 %v3106_v38  ;;  %1708 = vmatprep.subr.bf16.mxu1 %v3108_v57 }
  0xa2   :  { %2034 = vxpose.xlu0.b32.end [16/16] (narrow) %v2033_v29, 32  ;;  %v3431_v29 = vld [vmem:[#allocation14_spill] sm:$0xff] }
  0xa4   :  { %1678 = vmatpush3.bf16.msra.mxu0 %v3112_v60  ;;  %1710 = vmatpush3.bf16.msra.mxu1 %v3116_v20  ;;  %v1931_v41 = vpop.trf.xlu0 }
  0xa5   :  { %1680 = vmatprep.subr.bf16.mxu0 %v3122_v12  ;;  %1712 = vmatprep.subr.bf16.mxu1 %v3124_v37  ;;  %v1932_v17 = vunpack.i.l.bf16 %v1931_v41 }
  0xa8   :  { %1682 = vmatpush3.bf16.msra.mxu0 %v3128_v31  ;;  %1714 = vmatpush3.bf16.msra.mxu1 %v3132_v33  ;;  %v3146_v3 = vpop.trf.xlu0 }
  0xa9   :  { %1716 = vmatprep.subr.bf16.mxu0 %v3419_v39  ;;  %1748 = vmatprep.subr.bf16.mxu1 %v3420_v24  ;;  %v3444_v39 = vld [vmem:[#allocation28_spill] sm:$0xff]  ;;  %v3445_v24 = vld [vmem:[#allocation29_spill] sm:$0xff] }
  0xab   :  { %558 = vmatmul.mubr.f32.vlgmr.msra.gmra.mrb[2].mxu0 %v220_v21  ;;  %628 = vmatmul.mubr.f32.vlgmr.msra.gmra.mrb[2].mxu1 %v222_v62  ;;  %v3442_v21 = vld [vmem:[#allocation26_spill] sm:$0xff]  ;;  %v3443_v62 = vld [vmem:[#allocation27_spill] sm:$0xff] }
  0xac   :  { %1718 = vmatpush3.bf16.msra.mxu0 %v3422_v51  ;;  %1750 = vmatpush3.bf16.msra.mxu1 %v3423_v47  ;;  %v3153_v6 = vpop.trf.xlu0  ;;  %v3448_v47 = vld [vmem:[#allocation36_spill] sm:$0xff] }
  0xad   :  { %1720 = vmatprep.subr.bf16.mxu0 %v3424_v7  ;;  %1752 = vmatprep.subr.bf16.mxu1 %v3425_v22  ;;  %v3449_v7 = vld [vmem:[#allocation38_spill] sm:$0xff]  ;;  %v1883_v22 = vunpack.i.h.bf16 %v3421_v44 }
  0xae   :  { %960 = vmatprep.mubr.f32.mxu0 %v1880_v34  ;;  %1045 = vmatprep.mubr.f32.mxu1 %v1932_v17  ;;  %v3446_v34 = vld [vmem:[#allocation33_spill] sm:$0xff]  ;;  %v3447_v17 = vld [vmem:[#allocation35_spill] sm:$0xff] }
  0xb0   :  { %1722 = vmatpush3.bf16.msra.mxu0 %v3426_v14  ;;  %1754 = vmatpush3.bf16.msra.mxu1 %v3427_v63  ;;  %v3159_v25 = vpop.trf.xlu0  ;;  %v1935_v14 = vunpack.i.h.bf16 %v1931_v41  ;;  %v3450_v63 = vld [vmem:[#allocation39_spill] sm:$0xff]  ;;  %v1940_v41 = vunpack.i.h.bf16 %v3146_v3 }
  0xb1   :  { %1724 = vmatprep.subr.bf16.mxu0 %v3428_v4  ;;  %1756 = vmatprep.subr.bf16.mxu1 %v3429_v11  ;;  %v3451_v4 = vld [vmem:[#allocation40_spill] sm:$0xff] }
  0xb4   :  { %1726 = vmatpush3.bf16.msra.mxu0 %v3430_v43  ;;  %1758 = vmatpush3.bf16.msra.mxu1 %v3431_v29  ;;  %v3452_v43 = vld [vmem:[#allocation41_spill] sm:$0xff]  ;;  %v3453_v29 = vld [vmem:[#allocation42_spill] sm:$0xff] }
  0xb5   :  { %1728 = vmatprep.subr.bf16.mxu0 %v3432_v9  ;;  %1760 = vmatprep.subr.bf16.mxu1 %v3433_v54  ;;  %v1885_v9 = vunpack.i.l.bf16 %v2978_v36  ;;  %v1937_v54 = vunpack.i.l.bf16 %v3146_v3 }
  0xb8   :  { %1730 = vmatpush3.bf16.msra.mxu0 %v3434_v8  ;;  %1762 = vmatpush3.bf16.msra.mxu1 %v3435_v35  ;;  %v1888_v8 = vunpack.i.h.bf16 %v2978_v36  ;;  %v1890_v35 = vunpack.i.l.bf16 %v3000_v2  ;;  %v1893_v36 = vunpack.i.h.bf16 %v3000_v2  ;;  %v1898_v2 = vunpack.i.h.bf16 %v3024_v0 }
  0xb9   :  { %1732 = vmatprep.subr.bf16.mxu0 %v3436_v52  ;;  %1764 = vmatprep.subr.bf16.mxu1 %v3437_v61  ;;  %v1942_v52 = vunpack.i.l.bf16 %v3153_v6 }
  0xbc   :  { %1734 = vmatpush3.bf16.msra.mxu0 %v3438_v50  ;;  %1766 = vmatpush3.bf16.msra.mxu1 %v3439_v13 }
  0xbd   :  { %1736 = vmatprep.subr.bf16.mxu0 %v3440_v23  ;;  %1768 = vmatprep.subr.bf16.mxu1 %v3441_v18 }
  0xc0   :  { %1738 = vmatpush3.bf16.msra.mxu0 %v3442_v21  ;;  %1770 = vmatpush3.bf16.msra.mxu1 %v3443_v62 }
  0xc1   :  { %1740 = vmatprep.subr.bf16.mxu0 %v3444_v39  ;;  %1772 = vmatprep.subr.bf16.mxu1 %v3445_v24 }
  0xc4   :  { %1742 = vmatpush3.bf16.msra.mxu0 %v3446_v34  ;;  %1774 = vmatpush3.bf16.msra.mxu1 %v3447_v17 }
  0xc5   :  { %1744 = vmatprep.subr.bf16.mxu0 %v3448_v47  ;;  %1776 = vmatprep.subr.bf16.mxu1 %v3449_v7 }
  0xc6   :  { %v3181_v51 = vpop.trf.xlu1 }
  0xc8   :  { %1746 = vmatpush3.bf16.msra.mxu0 %v3450_v63  ;;  %1778 = vmatpush3.bf16.msra.mxu1 %v3451_v4 }
  0xc9   :  { %1780 = vmatprep.subr.bf16.mxu0 %v3452_v43  ;;  %1812 = vmatprep.subr.bf16.mxu1 %v3453_v29 }
  0xca   :  { %v3188_v11 = vpop.trf.xlu1 }
  0xcb   :  { %961 = vmatmul.mubr.f32.vlgmr.msra.gmra.mrb[4].mxu0 %v1883_v22  ;;  %1046 = vmatmul.mubr.f32.vlgmr.msra.gmra.mrb[4].mxu1 %v1935_v14 }
  0xcc   :  { %1782 = vmatpush3.bf16.msra.mxu0 %v3409_v19  ;;  %1814 = vmatpush3.bf16.msra.mxu1 %v2964_v1  ;;  %v1945_v19 = vunpack.i.h.bf16 %v3153_v6 }
  0xcd   :  { %1784 = vmatprep.subr.bf16.mxu0 %v3410_v32  ;;  %1816 = vmatprep.subr.bf16.mxu1 %v2986_v42  ;;  %v1895_v42 = vunpack.i.l.bf16 %v3024_v0  ;;  %v1947_v32 = vunpack.i.l.bf16 %v3159_v25 }
  0xce   :  { %v3198_v44 = vpop.trf.xlu1  ;;  %965 = vmatprep.mubr.f32.mxu0 %v1885_v9  ;;  %1050 = vmatprep.mubr.f32.mxu1 %v1937_v54 }
  0xcf   :  { %966 = vmatmul.mubr.f32.gmra.mrb[6].mxu0 %v1888_v8  ;;  %1051 = vmatmul.mubr.f32.gmra.mrb[6].mxu1 %v1940_v41 }
  0xd0   :  { %1786 = vmatpush3.bf16.msra.mxu0 %v3411_v53  ;;  %1818 = vmatpush3.bf16.msra.mxu1 %v2998_v55  ;;  %v1950_v53 = vunpack.i.h.bf16 %v3159_v25  ;;  %v1984_v55 = vunpack.i.l.bf16 %v3181_v51 }
  0xd1   :  { %1788 = vmatprep.subr.bf16.mxu0 %v3004_v26  ;;  %1820 = vmatprep.subr.bf16.mxu1 %v3008_v49  ;;  %v1987_v26 = vunpack.i.h.bf16 %v3181_v51 }
  0xd2   :  { %v3208_v1 = vpop.trf.xlu1  ;;  %970 = vmatprep.mubr.f32.mxu0 %v1890_v35  ;;  %1055 = vmatprep.mubr.f32.mxu1 %v1942_v52 }
  0xd3   :  { %971 = vmatmul.mubr.f32.gmra.mrb[8].mxu0 %v1893_v36  ;;  %1056 = vmatmul.mubr.f32.gmra.mrb[8].mxu1 %v1945_v19 }
  0xd4   :  { %1790 = vmatpush3.bf16.msra.mxu0 %v3412_v15  ;;  %1822 = vmatpush3.bf16.msra.mxu1 %v3022_v40 }
  0xd5   :  { %1792 = vmatprep.subr.bf16.mxu0 %v3030_v27  ;;  %1824 = vmatprep.subr.bf16.mxu1 %v3034_v28  ;;  %v1989_v27 = vunpack.i.l.bf16 %v3188_v11 }
  0xd6   :  { %975 = vmatprep.mubr.f32.mxu0 %v1895_v42  ;;  %1060 = vmatprep.mubr.f32.mxu1 %v1947_v32 }
  0xd7   :  { %976 = vmatmul.mubr.f32.gmra.mrb[10].mxu0 %v1898_v2  ;;  %1061 = vmatmul.mubr.f32.gmra.mrb[10].mxu1 %v1950_v53 }
  0xd8   :  { %1794 = vmatpush3.bf16.msra.mxu0 %v3044_v56  ;;  %1826 = vmatpush3.bf16.msra.mxu1 %v3050_v58  ;;  %v1992_v56 = vunpack.i.h.bf16 %v3188_v11 }
  0xd9   :  { %1796 = vmatprep.subr.bf16.mxu0 %v3056_v46  ;;  %1828 = vmatprep.subr.bf16.mxu1 %v3060_v45  ;;  %v1994_v46 = vunpack.i.l.bf16 %v3198_v44 }
  0xda   :  { %1130 = vmatprep.mubr.f32.mxu0 %v1984_v55 }
  0xdc   :  { %1798 = vmatpush3.bf16.msra.mxu0 %v3070_v59  ;;  %1830 = vmatpush3.bf16.msra.mxu1 %v3076_v5  ;;  %v1997_v59 = vunpack.i.h.bf16 %v3198_v44 }
  0xdd   :  { %1800 = vmatprep.subr.bf16.mxu0 %v3082_v16  ;;  %1832 = vmatprep.subr.bf16.mxu1 %v3085_v10  ;;  %v1999_v10 = vunpack.i.l.bf16 %v3208_v1 }
  0xe0   :  { %1802 = vmatpush3.bf16.msra.mxu0 %v3095_v48  ;;  %1834 = vmatpush3.bf16.msra.mxu1 %v3100_v30  ;;  %v2002_v48 = vunpack.i.h.bf16 %v3208_v1 }
  0xe1   :  { %1804 = vmatprep.subr.bf16.mxu0 %v3106_v38  ;;  %1836 = vmatprep.subr.bf16.mxu1 %v3108_v57 }
  0xe4   :  { %1806 = vmatpush3.bf16.msra.mxu0 %v3112_v60  ;;  %1838 = vmatpush3.bf16.msra.mxu1 %v3116_v20  ;;  %v2061_v60 = vmov 0.0  }
  0xe5   :  { %1808 = vmatprep.subr.bf16.mxu0 %v3122_v12  ;;  %1840 = vmatprep.subr.bf16.mxu1 %v3124_v37  ;;  %90 = vst.msk [vmem:[%s3305_s4] sm:$0x3] %vm89_vm0, %v2061_v60 }
  0xe6   :  { %v2035_v49 = vpop.trf.xlu0  ;;  %92 = vst.msk [vmem:[%s3306_s5] sm:$0xff] %vm91_vm1, %v2061_v60  ;;  %93 = vst.msk [vmem:[%s3306_s5 + $0x8] sm:$0xff] %vm91_vm1, %v2061_v60 }
  0xe7   :  { %v2039_v40 = vunpack.i.h.bf16 %v2035_v49  ;;  %v2036_v0 = vunpack.i.l.bf16 %v2035_v49  ;;  %94 = vst.msk [vmem:[%s3306_s5 + $0x10] sm:$0xff] %vm91_vm1, %v2061_v60  ;;  %95 = vst.msk [vmem:[%s3306_s5 + $0x18] sm:$0xff] %vm91_vm1, %v2061_v60 }
  0xe8   :  { %1810 = vmatpush3.bf16.msra.mxu0 %v3128_v31  ;;  %1842 = vmatpush3.bf16.msra.mxu1 %v3132_v33 }
  0xe9   :  { %1215 = vmatprep.mubr.f32.mxu1 %v2036_v0 }
  0xea   :  { %v2040_v28 = vpop.trf.xlu0 }
  0xeb   :  { %1131 = vmatmul.mubr.f32.vlgmr.msra.gmra.mrb[12].mxu0 %v1987_v26  ;;  %1216 = vmatmul.mubr.f32.vlgmr.msra.gmra.mrb[12].mxu1 %v2039_v40  ;;  %v2041_v15 = vunpack.i.l.bf16 %v2040_v28  ;;  %v2044_v58 = vunpack.i.h.bf16 %v2040_v28 }
  0xec   :  { %1135 = vmatprep.mubr.f32.mxu0 %v1989_v27  ;;  %v352_v62 = vld [vmem:[%s3305_s4] sm:$0x3] }
  0xed   :  { %1220 = vmatprep.mubr.f32.mxu1 %v2041_v15 }
  0xee   :  { %v2045_v45 = vpop.trf.xlu0 }
  0xef   :  { %1136 = vmatmul.mubr.f32.gmra.mrb[14].mxu0 %v1992_v56  ;;  %1221 = vmatmul.mubr.f32.gmra.mrb[14].mxu1 %v2044_v58  ;;  %v2046_v5 = vunpack.i.l.bf16 %v2045_v45  ;;  %v2049_v16 = vunpack.i.h.bf16 %v2045_v45  ;;  %v636_v45 = vld [vmem:[%s3306_s5] sm:$0xff] }
  0xf0   :  { %1140 = vmatprep.mubr.f32.mxu0 %v1994_v46 }
  0xf1   :  { %1225 = vmatprep.mubr.f32.mxu1 %v2046_v5 }
  0xf2   :  { %v2050_v30 = vpop.trf.xlu0 }
  0xf3   :  { %1141 = vmatmul.mubr.f32.gmra.mrb[16].mxu0 %v1997_v59  ;;  %v2054_v38 = vunpack.i.h.bf16 %v2050_v30  ;;  %v2051_v57 = vunpack.i.l.bf16 %v2050_v30  ;;  %1226 = vmatmul.mubr.f32.gmra.mrb[16].mxu1 %v2049_v16 }
  0xf4   :  { %1145 = vmatprep.mubr.f32.mxu0 %v1999_v10 }
  0xf5   :  { %1230 = vmatprep.mubr.f32.mxu1 %v2051_v57 }
  0xf7   :  { %1146 = vmatmul.mubr.f32.gmra.mrb[18].mxu0 %v2002_v48  ;;  %1231 = vmatmul.mubr.f32.gmra.mrb[18].mxu1 %v2054_v38 }
 0x15e   :  { %v1303_v20 = vpop.f32.mrb[0].mxu0  ;;  %v1338_v12 = vpop.f32.mrb[0].mxu1 }
 0x15f   :  { %v1304_v37 = vpop.f32.mrb[1].mxu0  ;;  %v1339_v31 = vpop.f32.mrb[1].mxu1 }
 0x160   :  { %v1305_v33 = vadd.f32 %v1304_v37, %v1303_v20  ;;  %v1340_v3 = vadd.f32 %v1339_v31, %v1338_v12  ;;  %v637_v20 = vld [vmem:[%s3306_s5 + $0x8] sm:$0xff] }
 0x162   :  { %v490_v6 = vadd.f32 %v1340_v3, %v1305_v33 }
 0x17e   :  { %v1373_v25 = vpop.f32.mrb[2].mxu0  ;;  %v1408_v61 = vpop.f32.mrb[2].mxu1 }
 0x17f   :  { %v1374_v50 = vpop.f32.mrb[3].mxu0  ;;  %v1409_v13 = vpop.f32.mrb[3].mxu1 }
 0x180   :  { %v1375_v23 = vadd.f32 %v1374_v50, %v1373_v25  ;;  %v1410_v18 = vadd.f32 %v1409_v13, %v1408_v61  ;;  %v638_v13 = vld [vmem:[%s3306_s5 + $0x10] sm:$0xff] }
 0x182   :  { %v560_v21 = vadd.f32 %v1375_v23, %v490_v6 }
 0x184   :  { %v630_v39 = vadd.f32 %v1410_v18, %v560_v21 }
 0x186   :  { %v633_v24 = vadd.f32 %v630_v39, %v352_v62 }
 0x188   :  { %635 = vst.msk [vmem:[%s3305_s4] sm:$0x3] %vm89_vm0, %v633_v24 }
 0x19e   :  { %v1443_v34 = vpop.f32.mrb[4].mxu0  ;;  %v1487_v17 = vpop.f32.mrb[4].mxu1 }
 0x19f   :  { %v1444_v51 = vpop.f32.mrb[5].mxu0  ;;  %v1488_v47 = vpop.f32.mrb[5].mxu1 }
 0x1a0   :  { %v1445_v7 = vadd.f32 %v1444_v51, %v1443_v34  ;;  %v1489_v22 = vadd.f32 %v1488_v47, %v1487_v17  ;;  %v639_v17 = vld [vmem:[%s3306_s5 + $0x18] sm:$0xff] }
 0x1a2   :  { %v1048_v14 = vadd.f32 %v1489_v22, %v1445_v7  ;;  %v1446_v63 = vpop.f32.mrb[6].mxu0  ;;  %v1490_v4 = vpop.f32.mrb[6].mxu1 }
 0x1a3   :  { %v1447_v11 = vpop.f32.mrb[7].mxu0  ;;  %v1491_v43 = vpop.f32.mrb[7].mxu1 }
 0x1a4   :  { %v1448_v29 = vadd.f32 %v1447_v11, %v1446_v63  ;;  %v1492_v9 = vadd.f32 %v1491_v43, %v1490_v4 }
 0x1a6   :  { %v1053_v54 = vadd.f32 %v1492_v9, %v1448_v29  ;;  %v1449_v8 = vpop.f32.mrb[8].mxu0  ;;  %v1493_v41 = vpop.f32.mrb[8].mxu1 }
 0x1a7   :  { %v1450_v44 = vpop.f32.mrb[9].mxu0  ;;  %v1494_v35 = vpop.f32.mrb[9].mxu1 }
 0x1a8   :  { %v1451_v52 = vadd.f32 %v1450_v44, %v1449_v8  ;;  %v1495_v36 = vadd.f32 %v1494_v35, %v1493_v41 }
 0x1aa   :  { %v1058_v19 = vadd.f32 %v1495_v36, %v1451_v52  ;;  %v1452_v1 = vpop.f32.mrb[10].mxu0  ;;  %v1496_v42 = vpop.f32.mrb[10].mxu1 }
 0x1ab   :  { %v1453_v32 = vpop.f32.mrb[11].mxu0  ;;  %v1497_v2 = vpop.f32.mrb[11].mxu1 }
 0x1ac   :  { %v1454_v53 = vadd.f32 %v1453_v32, %v1452_v1  ;;  %v1498_v55 = vadd.f32 %v1497_v2, %v1496_v42 }
 0x1ae   :  { %v1063_v26 = vadd.f32 %v1498_v55, %v1454_v53 }
 0x1be   :  { %v1531_v49 = vpop.f32.mrb[12].mxu0  ;;  %v1575_v40 = vpop.f32.mrb[12].mxu1 }
 0x1bf   :  { %v1532_v0 = vpop.f32.mrb[13].mxu0  ;;  %v1576_v27 = vpop.f32.mrb[13].mxu1 }
 0x1c0   :  { %v1533_v28 = vadd.f32 %v1532_v0, %v1531_v49  ;;  %v1577_v56 = vadd.f32 %v1576_v27, %v1575_v40 }
 0x1c2   :  { %v1133_v15 = vadd.f32 %v1533_v28, %v1048_v14  ;;  %v1534_v58 = vpop.f32.mrb[14].mxu0  ;;  %v1578_v46 = vpop.f32.mrb[14].mxu1 }
 0x1c3   :  { %v1535_v59 = vpop.f32.mrb[15].mxu0  ;;  %v1579_v5 = vpop.f32.mrb[15].mxu1 }
 0x1c4   :  { %v1218_v16 = vadd.f32 %v1577_v56, %v1133_v15  ;;  %v1536_v10 = vadd.f32 %v1535_v59, %v1534_v58  ;;  %v1580_v48 = vadd.f32 %v1579_v5, %v1578_v46 }
 0x1c6   :  { %v1236_v30 = vadd.f32 %v1218_v16, %v636_v45  ;;  %v1138_v38 = vadd.f32 %v1536_v10, %v1053_v54  ;;  %v1537_v57 = vpop.f32.mrb[16].mxu0  ;;  %v1581_v60 = vpop.f32.mrb[16].mxu1 }
 0x1c7   :  { %v1538_v12 = vpop.f32.mrb[17].mxu0  ;;  %v1582_v37 = vpop.f32.mrb[17].mxu1 }
 0x1c8   :  { %1241 = vst.msk [vmem:[%s3306_s5] sm:$0xff] %vm91_vm1, %v1236_v30  ;;  %v1223_v31 = vadd.f32 %v1580_v48, %v1138_v38  ;;  %v1539_v33 = vadd.f32 %v1538_v12, %v1537_v57  ;;  %v1583_v3 = vadd.f32 %v1582_v37, %v1581_v60 }
 0x1ca   :  { %v1237_v6 = vadd.f32 %v1223_v31, %v637_v20  ;;  %v1143_v25 = vadd.f32 %v1539_v33, %v1058_v19  ;;  %v1540_v61 = vpop.f32.mrb[18].mxu0  ;;  %v1584_v50 = vpop.f32.mrb[18].mxu1 }
 0x1cb   :  { %v1541_v23 = vpop.f32.mrb[19].mxu0  ;;  %v1585_v18 = vpop.f32.mrb[19].mxu1 }
 0x1cc   :  { %1242 = vst.msk [vmem:[%s3306_s5 + $0x8] sm:$0xff] %vm91_vm1, %v1237_v6  ;;  %v1228_v21 = vadd.f32 %v1583_v3, %v1143_v25  ;;  %v1542_v62 = vadd.f32 %v1541_v23, %v1540_v61  ;;  %v1586_v39 = vadd.f32 %v1585_v18, %v1584_v50 }
 0x1ce   :  { %v1238_v24 = vadd.f32 %v1228_v21, %v638_v13  ;;  %v1148_v34 = vadd.f32 %v1542_v62, %v1063_v26 }
 0x1d0   :  { %1243 = vst.msk [vmem:[%s3306_s5 + $0x10] sm:$0xff] %vm91_vm1, %v1238_v24  ;;  %v1233_v51 = vadd.f32 %v1586_v39, %v1148_v34 }
 0x1d2   :  { %v1239_v47 = vadd.f32 %v1233_v51, %v639_v17 }
 0x1d4   :  { %1244 = vst.msk [vmem:[%s3306_s5 + $0x18] sm:$0xff] %vm91_vm1, %v1239_v47 }

</bundles_post_ra>
